<compile_context>
chip_gen: v7x
topology: tpu7x:2x2x1
jax: 0.10.0
libtpu: 0.0.40
codegen_flags: <defaults>
</compile_context>

<pallas_src>
import jax
import jax.numpy as jnp
from jax.experimental import pallas as pl
from jax.experimental.pallas import tpu as pltpu


def residual_kernel(x_ref, w_ref, b_ref, o_ref):
    # x_ref: (bt, C, tl) tile, w_ref: (C, C) 1x1-conv weight, b_ref: (C, 1) bias
    bt, C, tl = x_ref.shape
    w = w_ref[...]
    # Hoisted: one lane-broadcast of the bias for the whole tile (not per i).
    bias_b = jnp.broadcast_to(b_ref[...].astype(jnp.float32), (C, tl))
    # Small static unroll over the batch sub-tile: each iteration is a clean
    # 2-D MXU matmul with the lane axis (tl) untouched — no transposes.
    for i in range(bt):
        xi = x_ref[i]                                                      # (C, tl)
        y = jnp.dot(w, xi, preferred_element_type=jnp.float32) + bias_b    # fn(x)
        o_ref[i] = (y + xi.astype(jnp.float32)).astype(o_ref.dtype)        # fn(x)+x


def _largest_divisor_at_most(n, cap):
    cap = max(1, min(n, cap))
    for d in range(cap, 0, -1):
        if n % d == 0:
            return d
    return 1


def _choose_tiles(B, C, L, x_itemsize, w_itemsize, tile_budget_bytes):
    """Pick (bt, tl): lane-dense L tile + batched step, under a VMEM budget."""
    # Reserve the double-buffered resident weight/bias against the budget so a
    # large C cannot starve the x/out double buffers (matters on v7x's 64 MiB).
    resident = 2 * (C * C + C) * w_itemsize
    budget = max(tile_budget_bytes - resident, 256 * 1024)
    if L % 128 == 0:
        # Largest multiple of 128 that divides L with one batch row in budget.
        max_units = max(1, budget // (C * 128 * x_itemsize))
        tl = 128 * _largest_divisor_at_most(L // 128, max_units)
    else:
        # Full extent is always a legal block (only hit for small, unpadded L).
        tl = L
    per_batch_bytes = C * tl * x_itemsize
    bt_cap = max(1, min(4, budget // per_batch_bytes))  # small unroll cap
    bt = _largest_divisor_at_most(B, bt_cap)
    return bt, tl


def _ensure_min_steps(B, L, bt, tl, min_steps):
    """Shrink tiles until the grid has >= min_steps steps (v7x megacore)."""
    def steps(bt_, tl_):
        return (B // bt_) * (L // tl_)

    while steps(bt, tl) < min_steps:
        if bt > 1:                                   # prefer keeping tl large
            bt = _largest_divisor_at_most(B, bt - 1)
            continue
        if L % 128 == 0 and tl > 128:
            units = _largest_divisor_at_most(L // 128, tl // 128 - 1)
            new_tl = 128 * units
            if new_tl < tl:
                tl = new_tl
                continue
        break                                        # cannot shrink further
    return bt, tl


def residual(x, w, b, *, bt=None, tl=None, tile_budget_bytes=6 << 20,
             io_dtype=None, min_grid_steps=4):
    """Residual(fn)(x) with fn = pointwise Conv1d(C->C, k=1); x: (B, C, L).

    io_dtype=jnp.bfloat16 gives the ~2x-bandwidth path (f32 accumulation kept).
    """
    B, C, L = x.shape
    assert w.shape == (C, C), "w must be the (C_out, C_in) 1x1-conv weight"
    if io_dtype is not None:
        x = x.astype(io_dtype)
        w = w.astype(io_dtype)
        b = b.astype(io_dtype)
    b = jnp.reshape(b, (C, 1))  # accept (C,) or (C, 1)

    # Lane-dense padding for ragged L: unmasked stores beat masked vst.msk.
    # (For L <= 128 the full-extent block is already legal and padding would
    # only inflate HBM bytes on a bandwidth-bound kernel.)
    Lp = L
    if L % 128 != 0 and L > 128:
        Lp = ((L + 127) // 128) * 128
        x = jnp.pad(x, ((0, 0), (0, 0), (0, Lp - L)))

    x_itemsize = jnp.dtype(x.dtype).itemsize
    w_itemsize = jnp.dtype(w.dtype).itemsize

    if bt is None or tl is None:
        auto_bt, auto_tl = _choose_tiles(B, C, Lp, x_itemsize, w_itemsize,
                                         tile_budget_bytes)
        auto_bt, auto_tl = _ensure_min_steps(B, Lp, auto_bt, auto_tl,
                                             min_grid_steps)
        bt = auto_bt if bt is None else bt
        tl = auto_tl if tl is None else tl
    assert B % bt == 0 and Lp % tl == 0, "tile sizes must divide (B, padded L)"

    grid = (B // bt, Lp // tl)

    # Explicit scoped-VMEM sizing: 2x double-buffered x + 2x out + resident
    # (double-buffered) w/b + one f32 matmul slab, with headroom.  Clamped to
    # stay v7x-safe (64 MiB physical VMEM per TensorCore).
    x_tile_bytes = bt * C * tl * x_itemsize
    resident_bytes = 2 * (C * C + C) * w_itemsize
    interm_bytes = C * tl * 4
    vmem_bytes = 4 * x_tile_bytes + resident_bytes + interm_bytes
    vmem_limit = int(min(max(int(vmem_bytes * 1.3) + (2 << 20), 16 << 20),
                         56 << 20))

    # Advisory cost hint for XLA's scheduler (kernel is bytes-dominated).
    cost = pl.CostEstimate(
        flops=2 * B * C * C * Lp,
        transcendentals=0,
        bytes_accessed=2 * B * C * Lp * x_itemsize
        + (C * C + C) * w_itemsize,
    )

    # TODO(synk): for very large C, DMA w/b once into VMEM scratch at the first
    # grid step instead of relying on the resident (double-buffered) block.
    out = pl.pallas_call(
        residual_kernel,
        out_shape=jax.ShapeDtypeStruct((B, C, Lp), x.dtype),
        grid=grid,
        in_specs=[
            # x: batched + lane-dense tile.
            pl.BlockSpec((bt, C, tl), lambda i, j: (i, 0, j)),
            # w, b: constant block index -> stay resident, no re-DMA per step.
            pl.BlockSpec((C, C), lambda i, j: (0, 0)),
            pl.BlockSpec((C, 1), lambda i, j: (0, 0)),
        ],
        out_specs=pl.BlockSpec((bt, C, tl), lambda i, j: (i, 0, j)),
        compiler_params=pltpu.CompilerParams(
            dimension_semantics=("parallel", "parallel"),
            vmem_limit_bytes=vmem_limit,
        ),
        cost_estimate=cost,
    )(x, w, b)

    if Lp != L:
        out = out[:, :, :L]
    return out


if __name__ == "__main__":
    key = jax.random.PRNGKey(0)
    kx, kw, kb = jax.random.split(key, 3)

    def ref_fn(x, w, b):
        # Pure-JAX reference: fn(x) + x with fn = pointwise Conv1d.
        return jnp.einsum("oc,bcl->bol", w, x) + b.reshape(1, -1, 1) + x

    # Small shapes; L maps onto the 128-lane axis.
    B, C, L = 4, 8, 512
    x = jax.random.normal(kx, (B, C, L), dtype=jnp.float32)
    w = jax.random.normal(kw, (C, C), dtype=jnp.float32) * 0.1
    b = jax.random.normal(kb, (C,), dtype=jnp.float32) * 0.1
    ref = ref_fn(x, w, b)

    # 1) Auto-tiled call (megacore guard expands the grid to >= 4 steps).
    out_auto = jax.block_until_ready(residual(x, w, b))
    assert out_auto.shape == (B, C, L)
    assert jnp.allclose(out_auto, ref, atol=1e-5, rtol=1e-5), "auto-tile mismatch"

    # 2) Explicit 2x2 grid to exercise both grid axes / index maps.
    out_tiled = jax.block_until_ready(residual(x, w, b, bt=2, tl=256))
    assert jnp.allclose(out_tiled, ref, atol=1e-5, rtol=1e-5), "tiled mismatch"

    # 3) Ragged L (exercises wrapper-side pad -> lane-dense stores -> slice).
    Lr = 200
    xr = jax.random.normal(kx, (B, C, Lr), dtype=jnp.float32)
    out_ragged = jax.block_until_ready(residual(xr, w, b))
    assert out_ragged.shape == (B, C, Lr)
    assert jnp.allclose(out_ragged, ref_fn(xr, w, b), atol=1e-5, rtol=1e-5), \
        "ragged-L mismatch"

    # 4) bf16 I/O path (~2x HBM bytes saved); accumulation stays f32 in-kernel.
    out_bf16 = jax.block_until_ready(residual(x, w, b, io_dtype=jnp.bfloat16))
    assert out_bf16.dtype == jnp.bfloat16
    assert jnp.allclose(out_bf16.astype(jnp.float32), ref, atol=5e-2, rtol=5e-2), \
        "bf16 path mismatch"

    print("KERNEL_OK")
</pallas_src>

<mosaic_0001>
module attributes {stable_mosaic.version = 11 : i64} {
  func.func @residual_kernel(%arg0: i32, %arg1: i32, %arg2: memref<1x8x512xf32, #tpu.memory_space<vmem>>, %arg3: memref<8x8xf32, #tpu.memory_space<vmem>>, %arg4: memref<8x1xf32, #tpu.memory_space<vmem>>, %arg5: memref<1x8x512xf32, #tpu.memory_space<vmem>>) attributes {dimension_semantics = [#tpu.dimension_semantics<parallel>, #tpu.dimension_semantics<parallel>], iteration_bounds = array<i64: 4, 1>, scalar_prefetch = 0 : i64, scratch_operands = 0 : i64, tpu.core_type = #tpu.core_type<tc>, window_params = [{transform_indices = @transform_0, window_bounds = array<i64: 1, 8, 512>}, {pipeline_mode = #tpu.pipeline_mode<synchronous>, transform_indices = @transform_1, window_bounds = array<i64: 8, 8>}, {pipeline_mode = #tpu.pipeline_mode<synchronous>, transform_indices = @transform_2, window_bounds = array<i64: 8, 1>}, {transform_indices = @transform_3, window_bounds = array<i64: 1, 8, 512>}]} {
    %c0 = arith.constant 0 : index
    %c0_0 = arith.constant 0 : index
    %0 = vector.load %arg3[%c0, %c0_0] : memref<8x8xf32, #tpu.memory_space<vmem>>, vector<8x8xf32>
    %c0_1 = arith.constant 0 : index
    %c0_2 = arith.constant 0 : index
    %1 = vector.load %arg4[%c0_1, %c0_2] : memref<8x1xf32, #tpu.memory_space<vmem>>, vector<8x1xf32>
    %2 = vector.shape_cast %1 : vector<8x1xf32> to vector<8x1xf32>
    %3 = vector.broadcast %2 : vector<8x1xf32> to vector<8x512xf32>
    %c0_3 = arith.constant 0 : index
    %c0_4 = arith.constant 0 : index
    %c0_5 = arith.constant 0 : index
    %4 = vector.load %arg2[%c0_3, %c0_4, %c0_5] : memref<1x8x512xf32, #tpu.memory_space<vmem>>, vector<1x8x512xf32>
    %5 = vector.shape_cast %4 : vector<1x8x512xf32> to vector<8x512xf32>
    %cst = arith.constant dense<0.000000e+00> : vector<8x512xf32>
    %6 = tpu.matmul %0, %5, %cst {dimension_numbers = #tpu.dot_dimension_numbers<[1], [0], [0], [1], [0, 0, 1, 1], [], []>} : vector<8x8xf32>, vector<8x512xf32>, vector<8x512xf32> -> vector<8x512xf32>
    %7 = arith.addf %6, %3 : vector<8x512xf32>
    %8 = arith.addf %7, %5 : vector<8x512xf32>
    %c0_6 = arith.constant 0 : index
    %c0_7 = arith.constant 0 : index
    %c0_8 = arith.constant 0 : index
    %9 = vector.load %arg5[%c0_6, %c0_7, %c0_8] : memref<1x8x512xf32, #tpu.memory_space<vmem>>, vector<1x8x512xf32>
    %10 = vector.shape_cast %9 : vector<1x8x512xf32> to vector<8x512xf32>
    %11 = vector.shape_cast %8 : vector<8x512xf32> to vector<1x8x512xf32>
    tpu.vector_store %arg5[%c0_6, %c0_7, %c0_8], %11 {strides = array<i32>} : memref<1x8x512xf32, #tpu.memory_space<vmem>>, vector<1x8x512xf32>,
    return
  }
  func.func @transform_0(%arg0: i32, %arg1: i32) -> (i32, i32, i32) {
    %c0_i32 = arith.constant 0 : i32
    %c0_i32_0 = arith.constant 0 : i32
    return %arg0, %c0_i32, %arg1 : i32, i32, i32
  }
  func.func @transform_1(%arg0: i32, %arg1: i32) -> (i32, i32) {
    %c0_i32 = arith.constant 0 : i32
    %c0_i32_0 = arith.constant 0 : i32
    %c0_i32_1 = arith.constant 0 : i32
    return %c0_i32, %c0_i32_0 : i32, i32
  }
  func.func @transform_2(%arg0: i32, %arg1: i32) -> (i32, i32) {
    %c0_i32 = arith.constant 0 : i32
    %c0_i32_0 = arith.constant 0 : i32
    %c0_i32_1 = arith.constant 0 : i32
    return %c0_i32, %c0_i32_0 : i32, i32
  }
  func.func @transform_3(%arg0: i32, %arg1: i32) -> (i32, i32, i32) {
    %c0_i32 = arith.constant 0 : i32
    %c0_i32_0 = arith.constant 0 : i32
    return %arg0, %c0_i32, %arg1 : i32, i32, i32
  }
}

</mosaic_0001>

<bundles_post_ra>
// kernel: tpu_custom_call.1
= control target key start
LH: loop header
LB: loop body
LE: loop exit
PB: predicated region body
PF: predicated region fallthrough
CT: control target
= control target key end

     0   :  { %8 = vsyncpa [#allocation3], 0  ;;  %s875_s0 = inlined_call_operand.hbm [shape: f32[4,8,512], index: 0, kind: input, shape index: {}]   ;;  %s876_s1 = inlined_call_operand.vmem [shape: f32[8,8], index: 1, kind: input, shape index: {}]   ;;  %s877_s2 = inlined_call_operand.vmem [shape: f32[8,1], index: 2, kind: input, shape index: {}]   ;;  %s878_s3 = inlined_call_operand.hbm [shape: f32[4,8,512], index: 3, kind: output, shape index: {}]  }
   0x1   :  { %10 = vsyncpa [#allocation3 + $0x1], 0 }
   0x2   :  { %11 = vsyncpa [#allocation4], 0 }
   0x3   :  { %13 = vsyncpa [#allocation4 + $0x1], 0  ;;  %s695_s12 = smov 0   ;;  %s697_s13 = smov 0  }
   0x4   :  { %s699_s14 = smov 0   ;;  %s701_s15 = smov 0  }
   0x5   :  { %s703_s16 = smov 0   ;;  %s705_s17 = smov 0  }
   0x6 LB: > { %s473_s18 = sadd.s32 4294967295, %s669_s17   ;;  %s474_s19 = sadd.s32 4294967294, %s669_s17   ;;  %s669_s17 = sphi %s705_s17, %s19_s17   ;;  %s665_s16 = sphi %s703_s16, %s893_s16   ;;  %s661_s15 = sphi %s701_s15, %s892_s15   ;;  %s657_s14 = sphi %s699_s14, %s891_s14   ;;  %s653_s13 = sphi %s697_s13, %s890_s13   ;;  %s649_s12 = sphi %s695_s12, %s889_s12  }
   0x7   : > { %s31_s20 = sadd.s32 1, %s665_s16  ;;  %s40_s21 = sadd.s32 1, %s657_s14 }
   0x8   : > { %p33_p0 = scmp.ge.s32.totalorder %s31_s20, 4  ;;  %p47_p1 = scmp.ne.s32.totalorder %s657_s14, %s653_s13 }
   0x9   : > { %p48_p2 = scmp.eq.s32.totalorder %s669_s17, 0  ;;  %p53_p3 = scmp.ne.s32.totalorder %s653_s13, %s649_s12 }
   0xa   : > { %s895_s20 = smov (%p33_p0, %s31_s20), 0  ;;  %p54_p5 = scmp.eq.s32.totalorder %s473_s18, 0 }
   0xb   : > { %p736_p4 = por %p48_p2, %p47_p1  ;;  %s35_s23 = ssub.s32 %s665_s16, %s895_s20 }
   0xc   : > { %p121_p6 = scmp.eq.s32.totalorder %s473_s18, 3  ;;  %p38_p7 = scmp.eq.s32.totalorder %s35_s23, 0 }
   0xd   : > { %p742_p8 = por %p54_p5, %p53_p3  ;;  %p127_p10 = scmp.eq.s32.totalorder %s474_s19, 3 }
   0xe   : > { %p746_p9 = por %p121_p6, %p47_p1  ;;  %p504_p12 = scmp.lt.s32.totalorder %s669_s17, 4 }
   0xf   : > { %s751_s26 = scalar_select %p38_p7, %s657_s14, %s40_s21  }
  0x10   : > { %s882_s25 = scalar_select %p746_p9, 1, 0 }
  0x11   : > { %p753_p11 = por %p127_p10, %p53_p3  ;;  %s153_s28 = sand.u32 1, %s657_s14  }
  0x12   : > { %s477_s29 = sshll.u32 %s153_s28, 5  ;;  %s490_s30 = sshll.u32 %s665_s16, 9 }
  0x13   : > { %s883_s27 = scalar_select %p753_p11, 1, 0 }
  0x14   : > { %s763_s6 = scalar_lea.hbm %s875_s0, %s490_s30  ;;  %s157_s7 = scalar_lea.vmem [#allocation2], %s477_s29 }
  0x15   : > { %s167_s8 = sshll.u32 %s157_s7, 4  ;;  %p769_p13 = pnand %p504_p12, %p736_p4  ;;  %s765_s8 = int_to_ptr.vmem [resolvable:$true] %s167_s8 }
  0x16   : > { %s154_s10 = scalar_lea.sflag [#allocation3], %s153_s28  ;;  %s557_s11 = scalar_lea.hbm %s763_s6, 512 }
  0x17   : > { %p558_p2 = scmp.ne.s32.totalorder %s763_s6, %s557_s11  ;;  %p559_p3 = pneg %p769_p13 }
  0x18   : > { %s562_s21 = scalar_lea.hbm %s875_s0, 2048  ;;  %p563_p4 = scmp.lt.u32.totalorder %s763_s6, %s875_s0 }
  0x19   : > { %p560_p5 = pnand %p559_p3, %p558_p2  ;;  %p564_p7 = scmp.lt.u32.totalorder %s562_s21, %s557_s11 }
  0x1a   : > { %p566_p12 = scmp.lt.u32.totalorder %s557_s11, %s763_s6 }
  0x1b   : > { %p561_p6 = pneg %p560_p5  ;;  %p565_p10 = por %p564_p7, %p563_p4 }
  0x1d   : > { %p567_p0 = por %p566_p12, %p565_p10 }
  0x1f   : > { %p568_p1 = pnand %p567_p0, %p561_p6 }
  0x21   : > { %571 = shalt.err (!%p568_p1)
}
  0x22   : > { %s572_s28 = scalar_lea.vmem %s765_s8, 512  ;;  %s671_s29 = smov [#allocation2]  }
  0x23   : > { %p573_p2 = scmp.ne.s32.totalorder %s765_s8, %s572_s28  ;;  %s577_s30 = sshll.u32 %s671_s29, 4  ;;  %s578_s30 = int_to_ptr.vmem [resolvable:$false] %s577_s30 }
  0x24   : > { %s579_s4 = scalar_lea.vmem %s578_s30, 1024  ;;  %p580_p9 = scmp.lt.s32.totalorder %s765_s8, %s578_s30 }
  0x25   : > { %p575_p5 = pnand %p573_p2, %p559_p3  ;;  %p581_p4 = scmp.lt.s32.totalorder %s579_s4, %s572_s28 }
  0x27   : > { %p576_p11 = pneg %p575_p5  ;;  %p582_p7 = por %p581_p4, %p580_p9 }
  0x29   : > { %p583_p10 = pnand %p582_p7, %p576_p11 }
  0x2b   : > { %586 = shalt.err (!%p583_p10)
}
  0x2c   : > { %499 = dma.hbm_to_vmem [thread:$0]  (!%p769_p13), %s763_s6, 512, %s765_s8, %s154_s10  }
  0x2d   : > { %p885_p0 = scmp.lt.s32.totalorder %s669_s17, 5  ;;  %p886_p1 = scmp.ge.s32.totalorder %s669_s17, 1 }
  0x2f   : > { %p173_p3 = pnand %p886_p1, %p885_p0 }
  0x30   : > { %s805_s5 = sand.u32 (!%p173_p3), 1, %s653_s13  }
  0x31   : > { %176 = sbr.rel (%p173_p3) target bundleno = 293 (0x125), region = 32  ;;  %s481_s7 = sshll.u32 (!%p173_p3), %s805_s5, 5 }
  0x32   : > { %s179_s11 = scalar_lea.sflag (!%p173_p3), [#allocation3], %s805_s5  ;;  %s182_s9 = scalar_lea.vmem (!%p173_p3), [#allocation2], %s481_s7 }
  0x38   : > { %640 = dma.done.wait (%p742_p8), %s179_s11, 512  }
  0x39   : > { %642 = vsyncadd (%p742_p8), %s179_s11, 4294966784  ;;  %v672_v0 = vmov 0.0   ;;  %v673_v1 = vmov 0   ;;  %v215_v2 = vld [vmem:[%s182_s9 + $0x8] sm:$0xff]  ;;  %v217_v3 = vld [vmem:[%s182_s9 + $0x18] sm:$0xff]  ;;  %vm218_vm0 = vcmask 64512  }
  0x3a   : > { %286 = vmatprep.mubr.f32.mxu0 %v672_v0  ;;  %357 = vmatprep.mubr.f32.mxu1 %v672_v0  ;;  %v214_v4 = vld [vmem:[%s182_s9] sm:$0xff]  ;;  %v216_v5 = vld [vmem:[%s182_s9 + $0x10] sm:$0xff]  ;;  %s491_s18 = sshll.u32 %s661_s15, 9  ;;  %s204_s19 = scalar_lea.vmem [#allocation5], %s481_s7 }
  0x3b   : > { %556 = vset.pattern.permute.xlu0 %v673_v1  ;;  %222 = vmatprep.subr.mxu0 %v215_v2  ;;  %v207_v6 = vld [vmem:[%s876_s1] sm:$0xff]  ;;  %s389_s21 = sshll.u32 %s204_s19, 4  ;;  %s827_s28 = scalar_lea.hbm %s878_s3, %s491_s18  ;;  %s829_s21 = int_to_ptr.vmem [resolvable:$true] %s389_s21 }
  0x3c   : > { %293 = vmatprep.subr.mxu1 %v217_v3  ;;  %v208_v7 = vld [vmem:[%s877_s2] sm:$0xff]  ;;  %223 = vmatpush1.msra.mxu0 %v214_v4  ;;  %s373_s15 = scalar_lea.sflag [#allocation4], %s805_s5  ;;  %s587_s29 = scalar_lea.vmem %s829_s21, 512 }
  0x3d   : > { %294 = vmatpush1.msra.mxu1 %v216_v5  ;;  %483 = vmatmul.mubr.msk.f32.vlgmr.msra.gmra.mrb[0].mxu0 %vm218_vm0, %v207_v6  ;;  %p588_p8 = scmp.ne.s32.totalorder %s829_s21, %s587_s29  ;;  %p887_p9 = scmp.ne.s32.totalorder %s882_s25, 0 }
  0x3e   : > { %484 = vmatmul.mubr.msk.f32.vlgmr.msra.gmra.mrb[0].mxu1 %vm218_vm0, %v207_v6  ;;  %211 = vperm.xlu0 %556, %v208_v7   ;;  %s674_s30 = smov [#allocation5]  }
  0x3f   : > { %p589_p11 = pnand %p588_p8, %p887_p9  ;;  %s591_s4 = sshll.u32 %s674_s30, 4  ;;  %s592_s4 = int_to_ptr.vmem [resolvable:$false] %s591_s4 }
  0x40   : > { %s593_s7 = scalar_lea.vmem %s592_s4, 1024  ;;  %p594_p6 = scmp.lt.s32.totalorder %s829_s21, %s592_s4 }
  0x41   : > { %p590_p13 = pneg %p589_p11  ;;  %p595_p12 = scmp.lt.s32.totalorder %s593_s7, %s587_s29 }
  0x43   : > { %p596_p2 = por %p595_p12, %p594_p6 }
  0x45   : > { %p597_p5 = pnand %p596_p2, %p590_p13 }
  0xbd   : > { %v212_v8 = vpop.permute.xlu0 %211 }
 0x110   : > { %v288_v9 = vpop.f32.mrb[0].mxu0 }
 0x111   : > { %v359_v10 = vpop.f32.mrb[0].mxu1  ;;  %v289_v11 = vadd.f32 %v288_v9, %v212_v8  ;;  %v290_v13 = vpop.f32.mrb[1].mxu0 }
 0x112   : > { %v360_v12 = vadd.f32 %v359_v10, %v212_v8  ;;  %v361_v14 = vpop.f32.mrb[1].mxu1  ;;  %v291_v15 = vadd.f32 %v290_v13, %v212_v8 }
 0x113   : > { %v362_v16 = vadd.f32 %v361_v14, %v212_v8  ;;  %v364_v17 = vadd.f32 %v289_v11, %v214_v4 }
 0x114   : > { %v366_v18 = vadd.f32 %v360_v12, %v216_v5  ;;  %v365_v19 = vadd.f32 %v291_v15, %v215_v2 }
 0x115   : > { %v367_v20 = vadd.f32 %v362_v16, %v217_v3  ;;  %368 = vst [vmem:[%s204_s19] sm:$0xff] %v364_v17 }
 0x116   : > { %370 = vst [vmem:[%s204_s19 + $0x10] sm:$0xff] %v366_v18  ;;  %369 = vst [vmem:[%s204_s19 + $0x8] sm:$0xff] %v365_v19 }
 0x117   : > { %371 = vst [vmem:[%s204_s19 + $0x18] sm:$0xff] %v367_v20 }
 0x118   : > { %600 = shalt.err (!%p597_p5)
}
 0x119   : > { %s601_s5 = scalar_lea.hbm %s827_s28, 512  ;;  %s605_s6 = scalar_lea.hbm %s878_s3, 2048 }
 0x11a   : > { %p602_p4 = scmp.ne.s32.totalorder %s827_s28, %s601_s5  ;;  %p606_p0 = scmp.lt.u32.totalorder %s827_s28, %s878_s3 }
 0x11b   : > { %p607_p1 = scmp.lt.u32.totalorder %s605_s6, %s601_s5  ;;  %p609_p8 = scmp.lt.u32.totalorder %s601_s5, %s827_s28 }
 0x11c   : > { %p603_p7 = pnand %p602_p4, %p887_p9 }
 0x11d   : > { %p608_p3 = por %p607_p1, %p606_p0 }
 0x11e   : > { %p604_p10 = pneg %p603_p7 }
 0x11f   : > { %p610_p11 = por %p609_p8, %p608_p3 }
 0x121   : > { %p611_p13 = pnand %p610_p11, %p604_p10 }
 0x123   : > { %614 = shalt.err (!%p611_p13)
}
 0x124   : > { %494 = dma.vmem_to_hbm [thread:$0]  (%p887_p9), %s829_s21, 512, %s827_s28, %s373_s15  }
 0x125 PF: > { %p505_p6 = scmp.ge.s32.totalorder %s669_s17, 2  ;;  %s401_s10 = sand.u32 1, %s649_s12  }
 0x126   : > { %p888_p12 = scmp.ne.s32.totalorder %s883_s27, 0  ;;  %s402_s18 = scalar_lea.sflag [#allocation4], %s401_s10 }
 0x128   : > { %p501_p2 = pnand %p505_p6, %p888_p12 }
 0x12a   : > { %644 = dma.done.wait (!%p501_p2), %s402_s18, 512  }
 0x12b   : > { %646 = vsyncadd (!%p501_p2), %s402_s18, 4294966784  ;;  %s19_s17 = sadd.s32 1, %s669_s17   ;;  %s889_s12 = smov %s653_s13 }
 0x12c   : > { %p16_p5 = scmp.ge.s32.totalorder %s19_s17, 6   ;;  %s890_s13 = smov %s657_s14 }
 0x12d   : > { %s891_s14 = smov %s751_s26  ;;  %s892_s15 = smov %s665_s16 }
 0x12e   : > { %s893_s16 = smov %s895_s20  ;;  %18 = sbr.rel (!%p16_p5) target bundleno = 6 (0x6), region = 77 }
 0x135   :  { %407 = vsyncpa [#allocation3], 1 }
 0x136   :  { %409 = vsyncpa [#allocation3 + $0x1], 1 }
 0x137   :  { %410 = vsyncpa [#allocation4], 1 }
 0x138   :  { %412 = vsyncpa [#allocation4 + $0x1], 1 }

</bundles_post_ra>
